<compile_context>
chip_gen: v6e
topology: v6e:2x2x1
jax: 0.10.0
libtpu: 0.0.40
codegen_flags: <defaults>
</compile_context>

<pallas_src>
import math

import jax
import jax.numpy as jnp
import numpy as np
from jax import lax
from jax.experimental import pallas as pl
from jax.experimental.pallas import tpu as pltpu

# ------------------------------ small config ------------------------------
B = 2            # batch
S = 8            # sequence length
D = 32           # d_model
H = 4            # n_heads
HD = D // H      # head_dim
DFF = 4 * D      # MLP hidden
EPS = 1e-5       # nn.LayerNorm default eps

_INV_D = 1.0 / D
_ATT_SCALE = 1.0 / math.sqrt(HD)
_INV_SQRT2 = 0.7071067811865476


# --------------------------------- kernel ----------------------------------
def transformer_block_kernel(
    x_ref,                  # (1, S, D)    one batch row of activations
    g1_ref, b1_ref,         # (1, D)       ln1 gamma / beta
    wqkv_ref, bqkv_ref,     # (D, 3D), (1, 3D)    fused QKV weight (pre-transposed) + bias
    wo_ref, bo_ref,         # (D, D), (1, D)      fused output projection (pre-transposed)
    g2_ref, b2_ref,         # (1, D)       ln2 gamma / beta
    w1_ref, bm1_ref,        # (D, 4D), (1, 4D)    MLP in  (pre-transposed)
    w2_ref, bm2_ref,        # (4D, D), (1, D)     MLP out (pre-transposed)
    o_ref,                  # (1, S, D)
):
    x = x_ref[0]                                                 # (S, D)

    # ---- LayerNorm 1 ----
    mu = jnp.sum(x, axis=-1, keepdims=True) * _INV_D
    xc = x - mu
    var = jnp.sum(xc * xc, axis=-1, keepdims=True) * _INV_D
    a = xc * lax.rsqrt(var + EPS) * g1_ref[...] + b1_ref[...]    # (S, D)

    # ---- fused QKV projection: ONE 2-D MXU matmul -> lane-dense (S, 3D) ----
    qkv2d = jnp.dot(a, wqkv_ref[...],
                    preferred_element_type=jnp.float32) + bqkv_ref[...]        # (S, 96)

    # Split the lane-dense slab into per-head tensors (cheap lane slices + leading-dim stack).
    def heads(base):                                             # -> (H, S, HD)
        return jnp.stack(
            [qkv2d[:, base + h * HD: base + (h + 1) * HD] for h in range(H)], axis=0)

    q3 = heads(0)                                                # (H, S, HD)
    k3 = heads(D)                                                # (H, S, HD)
    v3 = heads(2 * D)                                            # (H, S, HD)
    # One batched minor transpose (XLU vxpose) so the score matmul is NN-form on the MXU.
    k3t = jnp.swapaxes(k3, 1, 2)                                 # (H, HD, S)

    # ---- attention scores (NN form), causal mask built in-kernel ----
    scores = lax.dot_general(q3, k3t, (((2,), (1,)), ((0,), (0,))),
                             preferred_element_type=jnp.float32) * _ATT_SCALE  # (H, S, S)
    row = lax.broadcasted_iota(jnp.int32, (S, S), 0)
    col = lax.broadcasted_iota(jnp.int32, (S, S), 1)
    scores = jnp.where((col <= row)[None, :, :], scores, -jnp.inf)

    scores = scores - jnp.max(scores, axis=-1, keepdims=True)
    p = jnp.exp(scores)
    p = p * pl.reciprocal(jnp.sum(p, axis=-1, keepdims=True), approx=True)     # EUP reciprocal

    ctx = lax.dot_general(p, v3, (((2,), (1,)), ((0,), (0,))),
                          preferred_element_type=jnp.float32)                  # (H, S, HD)

    # ---- fused output projection: (S, H*HD) @ (D, D) in one matmul ----
    ctx2d = jnp.concatenate([ctx[h] for h in range(H)], axis=-1)               # (S, D)
    attn = jnp.dot(ctx2d, wo_ref[...],
                   preferred_element_type=jnp.float32) + bo_ref[...]           # (S, D)

    x1 = x + attn                                                # residual 1 (dropout1 = identity)

    # ---- LayerNorm 2 ----
    mu2 = jnp.sum(x1, axis=-1, keepdims=True) * _INV_D
    xc2 = x1 - mu2
    var2 = jnp.sum(xc2 * xc2, axis=-1, keepdims=True) * _INV_D
    m = xc2 * lax.rsqrt(var2 + EPS) * g2_ref[...] + b2_ref[...]

    # ---- MLP: Linear(D,4D) -> exact erf GELU -> Linear(4D,D) ----
    hdn = jnp.dot(m, w1_ref[...], preferred_element_type=jnp.float32) + bm1_ref[...]
    gelu = 0.5 * hdn * (1.0 + lax.erf(hdn * _INV_SQRT2))
    mlp = jnp.dot(gelu, w2_ref[...], preferred_element_type=jnp.float32) + bm2_ref[...]

    o_ref[0] = x1 + mlp                                          # residual 2 (dropout2 = identity)


# -------------------------------- wrapper ----------------------------------
def transformer_block(x, params):
    """x: (B, S, D) float32. params use the PyTorch nn.Linear (out, in) layout."""
    # Host-side weight re-layout: kernel never transposes weights or sums over heads.
    wqkv_t = params["wqkv"].T                                    # (D, 3D)
    wo_t = params["wo"].T                                        # (D, D)
    w1_t = params["w1"].T                                        # (D, 4D)
    w2_t = params["w2"].T                                        # (4D, D)

    def rep(shape):   # replicated (weight) operand: same full block at every grid step
        return pl.BlockSpec(shape, lambda b: (0,) * len(shape))

    in_specs = [
        pl.BlockSpec((1, S, D), lambda b: (b, 0, 0)),            # x: per-batch block
        rep((1, D)), rep((1, D)),                                # ln1
        rep((D, 3 * D)), rep((1, 3 * D)),                        # fused qkv
        rep((D, D)), rep((1, D)),                                # o_proj
        rep((1, D)), rep((1, D)),                                # ln2
        rep((D, DFF)), rep((1, DFF)),                            # mlp w1
        rep((DFF, D)), rep((1, D)),                              # mlp w2
    ]

    out = pl.pallas_call(
        transformer_block_kernel,
        out_shape=jax.ShapeDtypeStruct((B, S, D), jnp.float32),
        grid=(B,),
        in_specs=in_specs,
        out_specs=pl.BlockSpec((1, S, D), lambda b: (b, 0, 0)),
        compiler_params=pltpu.CompilerParams(dimension_semantics=("parallel",)),
    )(
        x,
        params["ln1_g"], params["ln1_b"],
        wqkv_t, params["bqkv"],
        wo_t, params["bo"],
        params["ln2_g"], params["ln2_b"],
        w1_t, params["b1"],
        w2_t, params["b2"],
    )
    return out


# --------------------------- pure-JAX reference -----------------------------
def reference(x, p):
    def ln(v, g, b):
        mu = jnp.mean(v, axis=-1, keepdims=True)
        var = jnp.mean((v - mu) ** 2, axis=-1, keepdims=True)
        return (v - mu) / jnp.sqrt(var + EPS) * g + b

    a = ln(x, p["ln1_g"], p["ln1_b"])
    qkv = a @ p["wqkv"].T + p["bqkv"]
    q, k, v = jnp.split(qkv, 3, axis=-1)
    q = q.reshape(B, S, H, HD).transpose(0, 2, 1, 3)
    k = k.reshape(B, S, H, HD).transpose(0, 2, 1, 3)
    v = v.reshape(B, S, H, HD).transpose(0, 2, 1, 3)
    scores = jnp.einsum("bhqd,bhkd->bhqk", q, k) / math.sqrt(HD)
    mask = jnp.tril(jnp.ones((S, S), bool))
    scores = jnp.where(mask, scores, -jnp.inf)
    w = jax.nn.softmax(scores, axis=-1)
    o = jnp.einsum("bhqk,bhkd->bhqd", w, v).transpose(0, 2, 1, 3).reshape(B, S, D)
    o = o @ p["wo"].T + p["bo"]
    x1 = x + o
    m = ln(x1, p["ln2_g"], p["ln2_b"])
    h = m @ p["w1"].T + p["b1"]
    g = 0.5 * h * (1.0 + lax.erf(h / math.sqrt(2.0)))
    return x1 + (g @ p["w2"].T + p["b2"])


# --------------------------------- main -------------------------------------
if __name__ == "__main__":
    key = jax.random.PRNGKey(0)
    ks = jax.random.split(key, 16)

    def init_w(k, shape, fan_in):
        bound = 1.0 / math.sqrt(fan_in)
        return jax.random.uniform(k, shape, jnp.float32, -bound, bound)

    params = {
        "ln1_g": jnp.ones((1, D), jnp.float32),
        "ln1_b": jnp.zeros((1, D), jnp.float32),
        "wqkv": init_w(ks[0], (3 * D, D), D),
        "bqkv": init_w(ks[1], (1, 3 * D), D),
        "wo": init_w(ks[2], (D, D), D),
        "bo": init_w(ks[3], (1, D), D),
        "ln2_g": jnp.ones((1, D), jnp.float32),
        "ln2_b": jnp.zeros((1, D), jnp.float32),
        "w1": init_w(ks[4], (4 * D, D), D),
        "b1": init_w(ks[5], (1, 4 * D), D),
        "w2": init_w(ks[6], (D, 4 * D), 4 * D),
        "b2": init_w(ks[7], (1, D), 4 * D),
    }

    x = jax.random.normal(ks[8], (B, S, D), jnp.float32)

    out = transformer_block(x, params)
    out = jax.block_until_ready(out)

    ref = reference(x, params)
    # tolerance accommodates the EUP approximate reciprocal in the softmax denominator
    np.testing.assert_allclose(np.asarray(out), np.asarray(ref), rtol=1e-3, atol=1e-3)

    print("KERNEL_OK")
</pallas_src>

<mosaic_0001>
module attributes {stable_mosaic.version = 11 : i64} {
  func.func @transformer_block_kernel(%arg0: i32, %arg1: memref<1x8x32xf32, #tpu.memory_space<vmem>>, %arg2: memref<1x32xf32, #tpu.memory_space<vmem>>, %arg3: memref<1x32xf32, #tpu.memory_space<vmem>>, %arg4: memref<32x96xf32, #tpu.memory_space<vmem>>, %arg5: memref<1x96xf32, #tpu.memory_space<vmem>>, %arg6: memref<32x32xf32, #tpu.memory_space<vmem>>, %arg7: memref<1x32xf32, #tpu.memory_space<vmem>>, %arg8: memref<1x32xf32, #tpu.memory_space<vmem>>, %arg9: memref<1x32xf32, #tpu.memory_space<vmem>>, %arg10: memref<32x128xf32, #tpu.memory_space<vmem>>, %arg11: memref<1x128xf32, #tpu.memory_space<vmem>>, %arg12: memref<128x32xf32, #tpu.memory_space<vmem>>, %arg13: memref<1x32xf32, #tpu.memory_space<vmem>>, %arg14: memref<1x8x32xf32, #tpu.memory_space<vmem>>) attributes {dimension_semantics = [#tpu.dimension_semantics<parallel>], iteration_bounds = array<i64: 2>, scalar_prefetch = 0 : i64, scratch_operands = 0 : i64, tpu.core_type = #tpu.core_type<tc>, window_params = [{transform_indices = @transform_0, window_bounds = array<i64: 1, 8, 32>}, {pipeline_mode = #tpu.pipeline_mode<synchronous>, transform_indices = @transform_1, window_bounds = array<i64: 1, 32>}, {pipeline_mode = #tpu.pipeline_mode<synchronous>, transform_indices = @transform_2, window_bounds = array<i64: 1, 32>}, {pipeline_mode = #tpu.pipeline_mode<synchronous>, transform_indices = @transform_3, window_bounds = array<i64: 32, 96>}, {pipeline_mode = #tpu.pipeline_mode<synchronous>, transform_indices = @transform_4, window_bounds = array<i64: 1, 96>}, {pipeline_mode = #tpu.pipeline_mode<synchronous>, transform_indices = @transform_5, window_bounds = array<i64: 32, 32>}, {pipeline_mode = #tpu.pipeline_mode<synchronous>, transform_indices = @transform_6, window_bounds = array<i64: 1, 32>}, {pipeline_mode = #tpu.pipeline_mode<synchronous>, transform_indices = @transform_7, window_bounds = array<i64: 1, 32>}, {pipeline_mode = #tpu.pipeline_mode<synchronous>, transform_indices = @transform_8, window_bounds = array<i64: 1, 32>}, {pipeline_mode = #tpu.pipeline_mode<synchronous>, transform_indices = @transform_9, window_bounds = array<i64: 32, 128>}, {pipeline_mode = #tpu.pipeline_mode<synchronous>, transform_indices = @transform_10, window_bounds = array<i64: 1, 128>}, {pipeline_mode = #tpu.pipeline_mode<synchronous>, transform_indices = @transform_11, window_bounds = array<i64: 128, 32>}, {pipeline_mode = #tpu.pipeline_mode<synchronous>, transform_indices = @transform_12, window_bounds = array<i64: 1, 32>}, {transform_indices = @transform_13, window_bounds = array<i64: 1, 8, 32>}]} {
    %c0 = arith.constant 0 : index
    %c0_0 = arith.constant 0 : index
    %c0_1 = arith.constant 0 : index
    %0 = vector.load %arg1[%c0, %c0_0, %c0_1] : memref<1x8x32xf32, #tpu.memory_space<vmem>>, vector<1x8x32xf32>
    %1 = vector.shape_cast %0 : vector<1x8x32xf32> to vector<8x32xf32>
    %cst = arith.constant dense<0.000000e+00> : vector<8xf32>
    %2 = vector.multi_reduction <add>, %1, %cst [1] : vector<8x32xf32> to vector<8xf32>
    %3 = vector.shape_cast %2 : vector<8xf32> to vector<8x1xf32>
    %cst_2 = arith.constant 3.125000e-02 : f32
    %4 = vector.broadcast %cst_2 : f32 to vector<8x1xf32>
    %5 = arith.mulf %3, %4 : vector<8x1xf32>
    %6 = vector.broadcast %5 : vector<8x1xf32> to vector<8x32xf32>
    %7 = arith.subf %1, %6 : vector<8x32xf32>
    %8 = arith.mulf %7, %7 : vector<8x32xf32>
    %cst_3 = arith.constant dense<0.000000e+00> : vector<8xf32>
    %9 = vector.multi_reduction <add>, %8, %cst_3 [1] : vector<8x32xf32> to vector<8xf32>
    %10 = vector.shape_cast %9 : vector<8xf32> to vector<8x1xf32>
    %cst_4 = arith.constant 3.125000e-02 : f32
    %11 = vector.broadcast %cst_4 : f32 to vector<8x1xf32>
    %12 = arith.mulf %10, %11 : vector<8x1xf32>
    %cst_5 = arith.constant 9.99999974E-6 : f32
    %13 = vector.broadcast %cst_5 : f32 to vector<8x1xf32>
    %14 = arith.addf %12, %13 : vector<8x1xf32>
    %15 = math.rsqrt %14 : vector<8x1xf32>
    %16 = vector.broadcast %15 : vector<8x1xf32> to vector<8x32xf32>
    %17 = arith.mulf %7, %16 : vector<8x32xf32>
    %c0_6 = arith.constant 0 : index
    %c0_7 = arith.constant 0 : index
    %18 = vector.load %arg2[%c0_6, %c0_7] : memref<1x32xf32, #tpu.memory_space<vmem>>, vector<1x32xf32>
    %19 = vector.broadcast %18 : vector<1x32xf32> to vector<8x32xf32>
    %20 = arith.mulf %17, %19 : vector<8x32xf32>
    %c0_8 = arith.constant 0 : index
    %c0_9 = arith.constant 0 : index
    %21 = vector.load %arg3[%c0_8, %c0_9] : memref<1x32xf32, #tpu.memory_space<vmem>>, vector<1x32xf32>
    %22 = vector.broadcast %21 : vector<1x32xf32> to vector<8x32xf32>
    %23 = arith.addf %20, %22 : vector<8x32xf32>
    %c0_10 = arith.constant 0 : index
    %c0_11 = arith.constant 0 : index
    %24 = vector.load %arg4[%c0_10, %c0_11] : memref<32x96xf32, #tpu.memory_space<vmem>>, vector<32x96xf32>
    %cst_12 = arith.constant dense<0.000000e+00> : vector<8x96xf32>
    %25 = tpu.matmul %23, %24, %cst_12 {dimension_numbers = #tpu.dot_dimension_numbers<[1], [0], [0], [1], [0, 0, 1, 1], [], []>} : vector<8x32xf32>, vector<32x96xf32>, vector<8x96xf32> -> vector<8x96xf32>
    %c0_13 = arith.constant 0 : index
    %c0_14 = arith.constant 0 : index
    %26 = vector.load %arg5[%c0_13, %c0_14] : memref<1x96xf32, #tpu.memory_space<vmem>>, vector<1x96xf32>
    %27 = vector.broadcast %26 : vector<1x96xf32> to vector<8x96xf32>
    %28 = arith.addf %25, %27 : vector<8x96xf32>
    %29 = vector.extract_strided_slice %28 {offsets = [0, 0], sizes = [8, 8], strides = [1, 1]} : vector<8x96xf32> to vector<8x8xf32>
    %30 = vector.extract_strided_slice %28 {offsets = [0, 8], sizes = [8, 8], strides = [1, 1]} : vector<8x96xf32> to vector<8x8xf32>
    %31 = vector.extract_strided_slice %28 {offsets = [0, 16], sizes = [8, 8], strides = [1, 1]} : vector<8x96xf32> to vector<8x8xf32>
    %32 = vector.extract_strided_slice %28 {offsets = [0, 24], sizes = [8, 8], strides = [1, 1]} : vector<8x96xf32> to vector<8x8xf32>
    %33 = vector.shape_cast %29 : vector<8x8xf32> to vector<1x8x8xf32>
    %34 = vector.shape_cast %30 : vector<8x8xf32> to vector<1x8x8xf32>
    %35 = vector.shape_cast %31 : vector<8x8xf32> to vector<1x8x8xf32>
    %36 = vector.shape_cast %32 : vector<8x8xf32> to vector<1x8x8xf32>
    %37 = tpu.concatenate %33, %34, %35, %36 in 0 : vector<1x8x8xf32>, vector<1x8x8xf32>, vector<1x8x8xf32>, vector<1x8x8xf32> -> vector<4x8x8xf32>
    %38 = vector.extract_strided_slice %28 {offsets = [0, 32], sizes = [8, 8], strides = [1, 1]} : vector<8x96xf32> to vector<8x8xf32>
    %39 = vector.extract_strided_slice %28 {offsets = [0, 40], sizes = [8, 8], strides = [1, 1]} : vector<8x96xf32> to vector<8x8xf32>
    %40 = vector.extract_strided_slice %28 {offsets = [0, 48], sizes = [8, 8], strides = [1, 1]} : vector<8x96xf32> to vector<8x8xf32>
    %41 = vector.extract_strided_slice %28 {offsets = [0, 56], sizes = [8, 8], strides = [1, 1]} : vector<8x96xf32> to vector<8x8xf32>
    %42 = vector.shape_cast %38 : vector<8x8xf32> to vector<1x8x8xf32>
    %43 = vector.shape_cast %39 : vector<8x8xf32> to vector<1x8x8xf32>
    %44 = vector.shape_cast %40 : vector<8x8xf32> to vector<1x8x8xf32>
    %45 = vector.shape_cast %41 : vector<8x8xf32> to vector<1x8x8xf32>
    %46 = tpu.concatenate %42, %43, %44, %45 in 0 : vector<1x8x8xf32>, vector<1x8x8xf32>, vector<1x8x8xf32>, vector<1x8x8xf32> -> vector<4x8x8xf32>
    %47 = vector.extract_strided_slice %28 {offsets = [0, 64], sizes = [8, 8], strides = [1, 1]} : vector<8x96xf32> to vector<8x8xf32>
    %48 = vector.extract_strided_slice %28 {offsets = [0, 72], sizes = [8, 8], strides = [1, 1]} : vector<8x96xf32> to vector<8x8xf32>
    %49 = vector.extract_strided_slice %28 {offsets = [0, 80], sizes = [8, 8], strides = [1, 1]} : vector<8x96xf32> to vector<8x8xf32>
    %50 = vector.extract_strided_slice %28 {offsets = [0, 88], sizes = [8, 8], strides = [1, 1]} : vector<8x96xf32> to vector<8x8xf32>
    %51 = vector.shape_cast %47 : vector<8x8xf32> to vector<1x8x8xf32>
    %52 = vector.shape_cast %48 : vector<8x8xf32> to vector<1x8x8xf32>
    %53 = vector.shape_cast %49 : vector<8x8xf32> to vector<1x8x8xf32>
    %54 = vector.shape_cast %50 : vector<8x8xf32> to vector<1x8x8xf32>
    %55 = tpu.concatenate %51, %52, %53, %54 in 0 : vector<1x8x8xf32>, vector<1x8x8xf32>, vector<1x8x8xf32>, vector<1x8x8xf32> -> vector<4x8x8xf32>
    %56 = tpu.transpose %46, [0, 2, 1] : vector<4x8x8xf32> -> vector<4x8x8xf32>
    %cst_15 = arith.constant dense<0.000000e+00> : vector<4x8x8xf32>
    %57 = tpu.matmul %37, %56, %cst_15 {dimension_numbers = #tpu.dot_dimension_numbers<[2], [1], [1], [2], [0, 0, 0, 1, 1, 2], [0], [0]>} : vector<4x8x8xf32>, vector<4x8x8xf32>, vector<4x8x8xf32> -> vector<4x8x8xf32>
    %cst_16 = arith.constant 0.353553385 : f32
    %58 = vector.broadcast %cst_16 : f32 to vector<4x8x8xf32>
    %59 = arith.mulf %57, %58 : vector<4x8x8xf32>
    %60 = tpu.iota {dimensions = array<i32: 0>} : vector<8x8xi32>
    %61 = tpu.iota {dimensions = array<i32: 1>} : vector<8x8xi32>
    %62 = arith.cmpi sle, %61, %60 : vector<8x8xi32>
    %63 = vector.shape_cast %62 : vector<8x8xi1> to vector<1x8x8xi1>
    %cst_17 = arith.constant 0xFF800000 : f32
    %64 = vector.shape_cast %63 : vector<1x8x8xi1> to vector<1x8x8xi1>
    %65 = vector.broadcast %64 : vector<1x8x8xi1> to vector<4x8x8xi1>
    %66 = vector.broadcast %cst_17 : f32 to vector<4x8x8xf32>
    %67 = arith.select %65, %59, %66 : vector<4x8x8xi1>, vector<4x8x8xf32>
    %cst_18 = arith.constant dense<0xFF800000> : vector<4x8xf32>
    %68 = vector.multi_reduction <maximumf>, %67, %cst_18 [2] : vector<4x8x8xf32> to vector<4x8xf32>
    %69 = vector.shape_cast %68 : vector<4x8xf32> to vector<4x8x1xf32>
    %70 = vector.broadcast %69 : vector<4x8x1xf32> to vector<4x8x8xf32>
    %71 = arith.subf %67, %70 : vector<4x8x8xf32>
    %72 = math.exp %71 : vector<4x8x8xf32>
    %cst_19 = arith.constant dense<0.000000e+00> : vector<4x8xf32>
    %73 = vector.multi_reduction <add>, %72, %cst_19 [2] : vector<4x8x8xf32> to vector<4x8xf32>
    %74 = vector.shape_cast %73 : vector<4x8xf32> to vector<4x8x1xf32>
    %75 = tpu.reciprocal %74 {approx = true} : vector<4x8x1xf32> -> vector<4x8x1xf32>
    %76 = vector.broadcast %75 : vector<4x8x1xf32> to vector<4x8x8xf32>
    %77 = arith.mulf %72, %76 : vector<4x8x8xf32>
    %cst_20 = arith.constant dense<0.000000e+00> : vector<4x8x8xf32>
    %78 = tpu.matmul %77, %55, %cst_20 {dimension_numbers = #tpu.dot_dimension_numbers<[2], [1], [1], [2], [0, 0, 0, 1, 1, 2], [0], [0]>} : vector<4x8x8xf32>, vector<4x8x8xf32>, vector<4x8x8xf32> -> vector<4x8x8xf32>
    %79 = vector.extract_strided_slice %78 {offsets = [0, 0, 0], sizes = [1, 8, 8], strides = [1, 1, 1]} : vector<4x8x8xf32> to vector<1x8x8xf32>
    %80 = vector.shape_cast %79 : vector<1x8x8xf32> to vector<8x8xf32>
    %81 = vector.extract_strided_slice %78 {offsets = [1, 0, 0], sizes = [1, 8, 8], strides = [1, 1, 1]} : vector<4x8x8xf32> to vector<1x8x8xf32>
    %82 = vector.shape_cast %81 : vector<1x8x8xf32> to vector<8x8xf32>
    %83 = vector.extract_strided_slice %78 {offsets = [2, 0, 0], sizes = [1, 8, 8], strides = [1, 1, 1]} : vector<4x8x8xf32> to vector<1x8x8xf32>
    %84 = vector.shape_cast %83 : vector<1x8x8xf32> to vector<8x8xf32>
    %85 = vector.extract_strided_slice %78 {offsets = [3, 0, 0], sizes = [1, 8, 8], strides = [1, 1, 1]} : vector<4x8x8xf32> to vector<1x8x8xf32>
    %86 = vector.shape_cast %85 : vector<1x8x8xf32> to vector<8x8xf32>
    %87 = tpu.concatenate %80, %82, %84, %86 in 1 : vector<8x8xf32>, vector<8x8xf32>, vector<8x8xf32>, vector<8x8xf32> -> vector<8x32xf32>
    %c0_21 = arith.constant 0 : index
    %c0_22 = arith.constant 0 : index
    %88 = vector.load %arg6[%c0_21, %c0_22] : memref<32x32xf32, #tpu.memory_space<vmem>>, vector<32x32xf32>
    %cst_23 = arith.constant dense<0.000000e+00> : vector<8x32xf32>
    %89 = tpu.matmul %87, %88, %cst_23 {dimension_numbers = #tpu.dot_dimension_numbers<[1], [0], [0], [1], [0, 0, 1, 1], [], []>} : vector<8x32xf32>, vector<32x32xf32>, vector<8x32xf32> -> vector<8x32xf32>
    %c0_24 = arith.constant 0 : index
    %c0_25 = arith.constant 0 : index
    %90 = vector.load %arg7[%c0_24, %c0_25] : memref<1x32xf32, #tpu.memory_space<vmem>>, vector<1x32xf32>
    %91 = vector.broadcast %90 : vector<1x32xf32> to vector<8x32xf32>
    %92 = arith.addf %89, %91 : vector<8x32xf32>
    %93 = arith.addf %1, %92 : vector<8x32xf32>
    %cst_26 = arith.constant dense<0.000000e+00> : vector<8xf32>
    %94 = vector.multi_reduction <add>, %93, %cst_26 [1] : vector<8x32xf32> to vector<8xf32>
    %95 = vector.shape_cast %94 : vector<8xf32> to vector<8x1xf32>
    %cst_27 = arith.constant 3.125000e-02 : f32
    %96 = vector.broadcast %cst_27 : f32 to vector<8x1xf32>
    %97 = arith.mulf %95, %96 : vector<8x1xf32>
    %98 = vector.broadcast %97 : vector<8x1xf32> to vector<8x32xf32>
    %99 = arith.subf %93, %98 : vector<8x32xf32>
    %100 = arith.mulf %99, %99 : vector<8x32xf32>
    %cst_28 = arith.constant dense<0.000000e+00> : vector<8xf32>
    %101 = vector.multi_reduction <add>, %100, %cst_28 [1] : vector<8x32xf32> to vector<8xf32>
    %102 = vector.shape_cast %101 : vector<8xf32> to vector<8x1xf32>
    %cst_29 = arith.constant 3.125000e-02 : f32
    %103 = vector.broadcast %cst_29 : f32 to vector<8x1xf32>
    %104 = arith.mulf %102, %103 : vector<8x1xf32>
    %cst_30 = arith.constant 9.99999974E-6 : f32
    %105 = vector.broadcast %cst_30 : f32 to vector<8x1xf32>
    %106 = arith.addf %104, %105 : vector<8x1xf32>
    %107 = math.rsqrt %106 : vector<8x1xf32>
    %108 = vector.broadcast %107 : vector<8x1xf32> to vector<8x32xf32>
    %109 = arith.mulf %99, %108 : vector<8x32xf32>
    %c0_31 = arith.constant 0 : index
    %c0_32 = arith.constant 0 : index
    %110 = vector.load %arg8[%c0_31, %c0_32] : memref<1x32xf32, #tpu.memory_space<vmem>>, vector<1x32xf32>
    %111 = vector.broadcast %110 : vector<1x32xf32> to vector<8x32xf32>
    %112 = arith.mulf %109, %111 : vector<8x32xf32>
    %c0_33 = arith.constant 0 : index
    %c0_34 = arith.constant 0 : index
    %113 = vector.load %arg9[%c0_33, %c0_34] : memref<1x32xf32, #tpu.memory_space<vmem>>, vector<1x32xf32>
    %114 = vector.broadcast %113 : vector<1x32xf32> to vector<8x32xf32>
    %115 = arith.addf %112, %114 : vector<8x32xf32>
    %c0_35 = arith.constant 0 : index
    %c0_36 = arith.constant 0 : index
    %116 = vector.load %arg10[%c0_35, %c0_36] : memref<32x128xf32, #tpu.memory_space<vmem>>, vector<32x128xf32>
    %cst_37 = arith.constant dense<0.000000e+00> : vector<8x128xf32>
    %117 = tpu.matmul %115, %116, %cst_37 {dimension_numbers = #tpu.dot_dimension_numbers<[1], [0], [0], [1], [0, 0, 1, 1], [], []>} : vector<8x32xf32>, vector<32x128xf32>, vector<8x128xf32> -> vector<8x128xf32>
    %c0_38 = arith.constant 0 : index
    %c0_39 = arith.constant 0 : index
    %118 = vector.load %arg11[%c0_38, %c0_39] : memref<1x128xf32, #tpu.memory_space<vmem>>, vector<1x128xf32>
    %119 = vector.broadcast %118 : vector<1x128xf32> to vector<8x128xf32>
    %120 = arith.addf %117, %119 : vector<8x128xf32>
    %cst_40 = arith.constant 5.000000e-01 : f32
    %121 = vector.broadcast %cst_40 : f32 to vector<8x128xf32>
    %122 = arith.mulf %121, %120 : vector<8x128xf32>
    %cst_41 = arith.constant 0.707106769 : f32
    %123 = vector.broadcast %cst_41 : f32 to vector<8x128xf32>
    %124 = arith.mulf %120, %123 : vector<8x128xf32>
    %125 = math.erf %124 : vector<8x128xf32>
    %cst_42 = arith.constant 1.000000e+00 : f32
    %126 = vector.broadcast %cst_42 : f32 to vector<8x128xf32>
    %127 = arith.addf %126, %125 : vector<8x128xf32>
    %128 = arith.mulf %122, %127 : vector<8x128xf32>
    %c0_43 = arith.constant 0 : index
    %c0_44 = arith.constant 0 : index
    %129 = vector.load %arg12[%c0_43, %c0_44] : memref<128x32xf32, #tpu.memory_space<vmem>>, vector<128x32xf32>
    %cst_45 = arith.constant dense<0.000000e+00> : vector<8x32xf32>
    %130 = tpu.matmul %128, %129, %cst_45 {dimension_numbers = #tpu.dot_dimension_numbers<[1], [0], [0], [1], [0, 0, 1, 1], [], []>} : vector<8x128xf32>, vector<128x32xf32>, vector<8x32xf32> -> vector<8x32xf32>
    %c0_46 = arith.constant 0 : index
    %c0_47 = arith.constant 0 : index
    %131 = vector.load %arg13[%c0_46, %c0_47] : memref<1x32xf32, #tpu.memory_space<vmem>>, vector<1x32xf32>
    %132 = vector.broadcast %131 : vector<1x32xf32> to vector<8x32xf32>
    %133 = arith.addf %130, %132 : vector<8x32xf32>
    %134 = arith.addf %93, %133 : vector<8x32xf32>
    %c0_48 = arith.constant 0 : index
    %c0_49 = arith.constant 0 : index
    %c0_50 = arith.constant 0 : index
    %135 = vector.load %arg14[%c0_48, %c0_49, %c0_50] : memref<1x8x32xf32, #tpu.memory_space<vmem>>, vector<1x8x32xf32>
    %136 = vector.shape_cast %135 : vector<1x8x32xf32> to vector<8x32xf32>
    %137 = vector.shape_cast %134 : vector<8x32xf32> to vector<1x8x32xf32>
    tpu.vector_store %arg14[%c0_48, %c0_49, %c0_50], %137 {strides = array<i32>} : memref<1x8x32xf32, #tpu.memory_space<vmem>>, vector<1x8x32xf32>,
    return
  }
  func.func @transform_0(%arg0: i32) -> (i32, i32, i32) {
    %c0_i32 = arith.constant 0 : i32
    %c0_i32_0 = arith.constant 0 : i32
    %c0_i32_1 = arith.constant 0 : i32
    return %arg0, %c0_i32, %c0_i32_0 : i32, i32, i32
  }
  func.func @transform_1(%arg0: i32) -> (i32, i32) {
    %c0_i32 = arith.constant 0 : i32
    %c0_i32_0 = arith.constant 0 : i32
    %c0_i32_1 = arith.constant 0 : i32
    return %c0_i32, %c0_i32_0 : i32, i32
  }
  func.func @transform_2(%arg0: i32) -> (i32, i32) {
    %c0_i32 = arith.constant 0 : i32
    %c0_i32_0 = arith.constant 0 : i32
    %c0_i32_1 = arith.constant 0 : i32
    return %c0_i32, %c0_i32_0 : i32, i32
  }
  func.func @transform_3(%arg0: i32) -> (i32, i32) {
    %c0_i32 = arith.constant 0 : i32
    %c0_i32_0 = arith.constant 0 : i32
    %c0_i32_1 = arith.constant 0 : i32
    return %c0_i32, %c0_i32_0 : i32, i32
  }
  func.func @transform_4(%arg0: i32) -> (i32, i32) {
    %c0_i32 = arith.constant 0 : i32
    %c0_i32_0 = arith.constant 0 : i32
    %c0_i32_1 = arith.constant 0 : i32
    return %c0_i32, %c0_i32_0 : i32, i32
  }
  func.func @transform_5(%arg0: i32) -> (i32, i32) {
    %c0_i32 = arith.constant 0 : i32
    %c0_i32_0 = arith.constant 0 : i32
    %c0_i32_1 = arith.constant 0 : i32
    return %c0_i32, %c0_i32_0 : i32, i32
  }
  func.func @transform_6(%arg0: i32) -> (i32, i32) {
    %c0_i32 = arith.constant 0 : i32
    %c0_i32_0 = arith.constant 0 : i32
    %c0_i32_1 = arith.constant 0 : i32
    return %c0_i32, %c0_i32_0 : i32, i32
  }
  func.func @transform_7(%arg0: i32) -> (i32, i32) {
    %c0_i32 = arith.constant 0 : i32
    %c0_i32_0 = arith.constant 0 : i32
    %c0_i32_1 = arith.constant 0 : i32
    return %c0_i32, %c0_i32_0 : i32, i32
  }
  func.func @transform_8(%arg0: i32) -> (i32, i32) {
    %c0_i32 = arith.constant 0 : i32
    %c0_i32_0 = arith.constant 0 : i32
    %c0_i32_1 = arith.constant 0 : i32
    return %c0_i32, %c0_i32_0 : i32, i32
  }
  func.func @transform_9(%arg0: i32) -> (i32, i32) {
    %c0_i32 = arith.constant 0 : i32
    %c0_i32_0 = arith.constant 0 : i32
    %c0_i32_1 = arith.constant 0 : i32
    return %c0_i32, %c0_i32_0 : i32, i32
  }
  func.func @transform_10(%arg0: i32) -> (i32, i32) {
    %c0_i32 = arith.constant 0 : i32
    %c0_i32_0 = arith.constant 0 : i32
    %c0_i32_1 = arith.constant 0 : i32
    return %c0_i32, %c0_i32_0 : i32, i32
  }
  func.func @transform_11(%arg0: i32) -> (i32, i32) {
    %c0_i32 = arith.constant 0 : i32
    %c0_i32_0 = arith.constant 0 : i32
    %c0_i32_1 = arith.constant 0 : i32
    return %c0_i32, %c0_i32_0 : i32, i32
  }
  func.func @transform_12(%arg0: i32) -> (i32, i32) {
    %c0_i32 = arith.constant 0 : i32
    %c0_i32_0 = arith.constant 0 : i32
    %c0_i32_1 = arith.constant 0 : i32
    return %c0_i32, %c0_i32_0 : i32, i32
  }
  func.func @transform_13(%arg0: i32) -> (i32, i32, i32) {
    %c0_i32 = arith.constant 0 : i32
    %c0_i32_0 = arith.constant 0 : i32
    %c0_i32_1 = arith.constant 0 : i32
    return %arg0, %c0_i32, %c0_i32_0 : i32, i32, i32
  }
}

</mosaic_0001>

<bundles_post_ra>
// kernel: tpu_custom_call.1
= control target key start
LH: loop header
LB: loop body
LE: loop exit
PB: predicated region body
PF: predicated region fallthrough
CT: control target
= control target key end

     0   :  { %s2342_s0 = inlined_call_operand.vmem [shape: f32[2,8,32], index: 0, kind: input, shape index: {}]   ;;  %s2343_s1 = inlined_call_operand.vmem [shape: f32[1,32], index: 1, kind: input, shape index: {}]   ;;  %s2344_s2 = inlined_call_operand.vmem [shape: f32[1,32], index: 2, kind: input, shape index: {}]   ;;  %s2345_s3 = inlined_call_operand.vmem [shape: f32[32,96], index: 3, kind: input, shape index: {}]   ;;  %s2346_s4 = inlined_call_operand.vmem [shape: f32[1,96], index: 4, kind: input, shape index: {}]   ;;  %s2347_s5 = inlined_call_operand.vmem [shape: f32[32,32], index: 5, kind: input, shape index: {}]   ;;  %s2348_s6 = inlined_call_operand.vmem [shape: f32[1,32], index: 6, kind: input, shape index: {}]   ;;  %s2349_s7 = inlined_call_operand.vmem [shape: f32[1,32], index: 7, kind: input, shape index: {}]   ;;  %s2350_s8 = inlined_call_operand.vmem [shape: f32[1,32], index: 8, kind: input, shape index: {}]   ;;  %s2351_s9 = inlined_call_operand.vmem [shape: f32[32,128], index: 9, kind: input, shape index: {}]   ;;  %s2352_s10 = inlined_call_operand.vmem [shape: f32[1,128], index: 10, kind: input, shape index: {}]   ;;  %s2353_s11 = inlined_call_operand.vmem [shape: f32[128,32], index: 11, kind: input, shape index: {}]   ;;  %s2354_s12 = inlined_call_operand.vmem [shape: f32[1,32], index: 12, kind: input, shape index: {}]   ;;  %s2355_s13 = inlined_call_operand.hbm [shape: f32[2,8,32], index: 13, kind: output, shape index: {}]  }
   0x1   :  { %2356 = sst [smem:[#allocation5_spill]] %s2342_s0 }
   0x2   :  { %2357 = sst [smem:[#allocation6_spill]] %s2343_s1 }
   0x3   :  { %2358 = sst [smem:[#allocation7_spill]] %s2344_s2 }
   0x4   :  { %2359 = sst [smem:[#allocation8_spill]] %s2345_s3 }
   0x5   :  { %18 = vsyncpa [#allocation3], 0 }
   0x6   :  { %20 = vsyncpa [#allocation3 + $0x1], 0  ;;  %s2017_s25 = smov 0   ;;  %s2019_s26 = smov 0  }
   0x7   :  { %s2021_s27 = smov 0   ;;  %s2023_s28 = smov 0  }
   0x8 LB: > { %s2038_s29 = sadd.s32 4294967295, %s1934_s28   ;;  %s1614_s30 = sadd.s32 4294967294, %s1934_s28   ;;  %s1934_s28 = sphi %s2023_s28, %s2369_s28   ;;  %s1930_s27 = sphi %s2021_s27, %s2368_s27   ;;  %s1926_s26 = sphi %s2019_s26, %s2367_s26   ;;  %s1922_s25 = sphi %s2017_s25, %s2366_s25  }
   0x9   : > { %s2042_s14 = sadd.s32 1, %s1934_s28   ;;  %s311_s15 = sadd.s32 1, %s1930_s27 }
   0xa   : > { %s308_s16 = ssub.s32 %s1934_s28, %s2042_s14  ;;  %p321_p0 = scmp.ne.s32.totalorder %s1930_s27, %s1926_s26 }
   0xb   : > { %p309_p1 = scmp.eq.s32.totalorder %s308_s16, 0  ;;  %p322_p2 = scmp.eq.s32.totalorder %s2038_s29, 1 }
   0xc   : > { %p327_p3 = scmp.ne.s32.totalorder %s1926_s26, %s1922_s25  ;;  %p328_p4 = scmp.eq.s32.totalorder %s1614_s30, 1 }
   0xd   : > { %s2053_s17 = scalar_select %p309_p1, %s1930_s27, %s311_s15  }
   0xe   : > { %p2055_p5 = por %p322_p2, %p321_p0  ;;  %p2059_p6 = por %p328_p4, %p327_p3 }
   0xf   : > { %p1617_p7 = scmp.ge.s32.totalorder %s1934_s28, 1  ;;  %p389_p8 = scmp.lt.s32.totalorder %s1934_s28, 3 }
  0x11   : > { %p390_p9 = pnand %p1617_p7, %p389_p8 }
  0x12   : > { %p432_p10 = scmp.lt.s32.totalorder (!%p390_p9), %s2038_s29, 1  ;;  %s2362_s0 = sld [smem:[#allocation5_spill]] (!%p390_p9) }
  0x13   : > { %393 = sbr.rel (%p390_p9) target bundleno = 2520 (0x9d8), region = 72  ;;  %s2363_s3 = sld [smem:[#allocation8_spill]] (!%p390_p9) }
  0x14   : > { %s2364_s1 = sld [smem:[#allocation6_spill]] (!%p390_p9)  ;;  %s1938_s23 = smov (!%p390_p9), 104  }
  0x15   : > { %s2365_s2 = sld [smem:[#allocation7_spill]] (!%p390_p9)  ;;  %s1940_s30 = smov (!%p390_p9), 112  }
  0x16   : > { %s1941_s15 = smov (!%p390_p9), 96   ;;  %s1942_s16 = smov (!%p390_p9), 64  }
  0x17   : > { %s1945_s22 = smov (!%p390_p9), 24  }
  0x18   : > { %s433_s20 = scalar_select %p432_p10, %s2038_s29, 1  ;;  %vm437_vm0 = vcmask 261120   ;;  %v1936_v8 = vmov 0.0   ;;  %vm1937_vm1 = vmmov 0   ;;  %v1622_v21 = vld [vmem:[%s2346_s4] ss:$0 sm:$0xff]  ;;  %v867_v32 = vlaneseq }
  0x19   : > { %v470_v7 = vld [vmem:[%s2363_s3 + $0x18] sm:$0xff]  ;;  %1695 = vmatprep.subr.mxu1 %v1936_v8  ;;  %v469_v9 = vld [vmem:[%s2363_s3 + $0x10] sm:$0xff]  ;;  %1703 = vmatprep.mubr.msk.f32.mxu1 %vm1937_vm1, %v1936_v8  ;;  %v468_v10 = vld [vmem:[%s2363_s3 + $0x8] sm:$0xff]  ;;  %vm560_vm2 = vcmask 64512   ;;  %vm1239_vm4 = vcmask 130048   ;;  %vm1241_vm5 = vcmask 195584  }
  0x1a   : > { %s1619_s21 = sshll.u32 %s433_s20, 3  ;;  %1696 = vmatpush3.msra.mxu1 %v470_v7  ;;  %1716 = vmatprep.subr.mxu0 %v1936_v8  ;;  %v467_v11 = vld [vmem:[%s2363_s3] sm:$0xff]  ;;  %v868_v33 = vshrl.u32 %v867_v32, 7  ;;  %v870_v34 = vand.u32 127, %v867_v32  ;;  %v1245_v32 = vld [vmem:[%s2347_s5 + $0x10] sm:$0xff]  ;;  %s1943_s20 = smov 8  }
  0x1b   : > { %s435_s24 = scalar_lea.vmem %s2362_s0, %s1619_s21  ;;  %1697 = vmatprep.subr.mxu1 %v1936_v8  ;;  %1718 = vmatprep.mubr.msk.f32.mxu0 %vm1937_vm1, %v1936_v8  ;;  %v1620_v16 = vld [vmem:[%s2364_s1] ss:$0 sm:$0xff]  ;;  %s1944_s21 = smov 16  }
  0x1c   : > { %v2070_v0 = vld [vmem:[%s435_s24] sm:$0xff]  ;;  %1698 = vmatpush3.msra.mxu1 %v469_v9  ;;  %s1939_s24 = smov 120   ;;  %vm871_vm3 = vcmp.le.s32.totalorder %v870_v34, %v868_v33  ;;  %v1244_v33 = vld [vmem:[%s2347_s5 + $0x8] sm:$0xff] }
  0x1d   : > { %v438_v1 = vsel %vm437_vm0, %v2070_v0, 0.0  ;;  %1699 = vmatprep.subr.mxu1 %v1936_v8  ;;  %v1621_v18 = vld [vmem:[%s2365_s2] ss:$0 sm:$0xff] }
  0x1e   : > { %439 = vadd.xlane.f32.xlu0 %v438_v1  ;;  %1700 = vmatpush3.msra.mxu1 %v468_v10  ;;  %v1243_v34 = vld [vmem:[%s2347_s5] sm:$0xff] }
  0x1f   : > { %1701 = vmatprep.subr.mxu1 %v1936_v8 }
  0x20   : > { %1702 = vmatpush3.msra.mxu1 %v467_v11 }
  0x21   : > { %1706 = vmatprep.subr.mxu1 %v1936_v8 }
  0xa7   : > { %v440_v2 = vpop.xlane.xlu0 %439 }
  0xa8   : > { %v441_v3 = vmul.f32 0.03125, %v440_v2 }
  0xaa   : > { %v442_v4 = vsub.f32 %v2070_v0, %v441_v3 }
  0xac   : > { %v443_v5 = vmul.f32 %v442_v4, %v442_v4 }
  0xae   : > { %v444_v6 = vsel %vm437_vm0, %v443_v5, 0.0 }
  0xaf   : > { %445 = vadd.xlane.f32.xlu0 %v444_v6 }
 0x138   : > { %v446_v12 = vpop.xlane.xlu0 %445 }
 0x139   : > { %v447_v13 = vmul.f32 0.03125, %v446_v12 }
 0x13b   : > { %v448_v14 = vadd.f32 1e-05, %v447_v13 }
 0x13d   : > { %1852 = vrsqrt.f32 %v448_v14 }
 0x14a   : > { %v1853_v15 = vpop.eup %1852 }
 0x14b   : > { %v450_v17 = vmul.f32 %v1853_v15, %v442_v4 }
 0x14d   : > { %v458_v19 = vmul.f32 %v1620_v16, %v450_v17 }
 0x14f   : > { %v466_v20 = vadd.f32 %v1621_v18, %v458_v19 }
 0x151   : > { %1704 = vmatmul.mubr.msk.f32.vlgmr.msra.gmra.mxu1 %vm437_vm0, %v466_v20 }
 0x152   : > { %1708 = vmatprep.mubr.msk.f32.mxu1 %vm1937_vm1, %v1936_v8 }
 0x211   : > { %v547_v22 = vpop.f32.mrf.mxu1 }
 0x212   : > { %v2110_v23 = vadd.f32 %v1622_v21, %v547_v22 }
 0x213   : > { %v1705_v24 = vpop.f32.mrf.mxu1 }
 0x214   : > { %556 = vrot.lane.b32.xlu0 %v2110_v23, %s1938_s23  ;;  %552 = vrot.lane.b32.xlu1 %v2110_v23, %s1939_s24  ;;  %s429_s23 = sand.u32 1, %s1926_s26  }
 0x215   : > { %s1618_s24 = sshll.u32 %s429_s23, 3  ;;  %s1542_s2 = scalar_lea.sflag [#allocation3], %s429_s23 }
 0x218   : > { %554 = vrot.lane.b32.xlu1 %v2110_v23, %s1940_s30 }
 0x21c   : > { %558 = vrot.lane.b32.xlu1 %v2110_v23, %s1941_s15 }
 0x286   : > { %v2116_v25 = vpop.permute.xlu1 %552  ;;  %v2122_v27 = vpop.permute.xlu0 %556 }
 0x287   : > { %635 = vrot.lane.b32.xlu1 %v2116_v25, %s1941_s15 }
 0x28a   : > { %v2119_v26 = vpop.permute.xlu1 %554 }
 0x28b   : > { %711 = vrot.lane.b32.xlu1 %v2119_v26, %s1941_s15 }
 0x28e   : > { %v559_v28 = vpop.permute.xlu1 %558 }
 0x28f   : > { %787 = vrot.lane.b32.xlu1 %v2122_v27, %s1941_s15  ;;  %1707 = vmatpush3.xpose.msk.msra.mxu1 %vm560_vm2, %v559_v28 }
 0x290   : > { %1711 = vmatprep.subr.mxu1 %v1936_v8 }
 0x292   : > { %1709 = vmatmul.mubr.msk.f32.vlgmr.msra.gmra.mxu1 %vm560_vm2, %v2110_v23 }
 0x293   : > { %1713 = vmatprep.mubr.msk.f32.mxu1 %vm1937_vm1, %v1936_v8 }
 0x2f9   : > { %v636_v29 = vpop.permute.xlu1 %635 }
 0x2fa   : > { %1712 = vmatpush3.xpose.msk.msra.mxu1 %vm560_vm2, %v636_v29 }
 0x2fb   : > { %1721 = vmatprep.subr.mxu1 %v1936_v8 }
 0x2fd   : > { %1714 = vmatmul.mubr.msk.f32.vlgmr.msra.gmra.mxu1 %vm560_vm2, %v2116_v25  ;;  %v712_v30 = vpop.permute.xlu1 %711 }
 0x2fe   : > { %1717 = vmatpush3.xpose.msk.msra.mxu0 %vm560_vm2, %v712_v30  ;;  %1723 = vmatprep.mubr.msk.f32.mxu1 %vm1937_vm1, %v1936_v8 }
 0x2ff   : > { %1726 = vmatprep.subr.mxu0 %v1936_v8 }
 0x301   : > { %1719 = vmatmul.mubr.msk.f32.vlgmr.msra.gmra.mxu0 %vm560_vm2, %v2119_v26  ;;  %v788_v31 = vpop.permute.xlu1 %787 }
 0x302   : > { %1722 = vmatpush3.xpose.msk.msra.mxu1 %vm560_vm2, %v788_v31  ;;  %1728 = vmatprep.mubr.msk.f32.mxu0 %vm1937_vm1, %v1936_v8  ;;  %v1246_v31 = vld [vmem:[%s2347_s5 + $0x18] sm:$0xff] }
 0x303   : > { %1731 = vmatprep.subr.mxu1 %v1936_v8 }
 0x305   : > { %1724 = vmatmul.mubr.msk.f32.vlgmr.msra.gmra.mxu1 %vm560_vm2, %v2122_v27 }
 0x306   : > { %1733 = vmatprep.mubr.msk.f32.mxu1 %vm1937_vm1, %v1936_v8 }
 0x352   : > { %v631_v35 = vpop.f32.mrf.mxu1 }
 0x353   : > { %v863_v36 = vmul.f32 0.35355338, %v631_v35 }
 0x354   : > { %v1710_v37 = vpop.f32.mrf.mxu1 }
 0x355   : > { %v874_v38 = vsel %vm871_vm3, %v863_v36, -inf }
 0x356   : > { %v878_v39 = vsel %vm560_vm2, %v874_v38, -inf }
 0x357   : > { %879 = vmax.xlane.f32.xlu1 %v878_v39 }
 0x3bd   : > { %v707_v40 = vpop.f32.mrf.mxu1 }
 0x3be   : > { %v864_v41 = vmul.f32 0.35355338, %v707_v40 }
 0x3bf   : > { %v1715_v42 = vpop.f32.mrf.mxu1 }
 0x3c0   : > { %v875_v43 = vsel %vm871_vm3, %v864_v41, -inf }
 0x3c1   : > { %v783_v44 = vpop.f32.mrf.mxu0  ;;  %v881_v45 = vsel %vm560_vm2, %v875_v43, -inf }
 0x3c2   : > { %v865_v46 = vmul.f32 0.35355338, %v783_v44  ;;  %882 = vmax.xlane.f32.xlu0 %v881_v45 }
 0x3c3   : > { %v1720_v47 = vpop.f32.mrf.mxu0 }
 0x3c4   : > { %v876_v48 = vsel %vm871_vm3, %v865_v46, -inf  ;;  %v1636_v47 = vld [vmem:[%s2348_s6] ss:$0 sm:$0xff] }
 0x3c5   : > { %v859_v49 = vpop.f32.mrf.mxu1  ;;  %v884_v50 = vsel %vm560_vm2, %v876_v48, -inf }
 0x3c6   : > { %v866_v51 = vmul.f32 0.35355338, %v859_v49  ;;  %885 = vmax.xlane.f32.xlu1 %v884_v50 }
 0x3c7   : > { %v1725_v52 = vpop.f32.mrf.mxu1 }
 0x3c8   : > { %v877_v53 = vsel %vm871_vm3, %v866_v51, -inf }
 0x3c9   : > { %v887_v54 = vsel %vm560_vm2, %v877_v53, -inf }
 0x3ca   : > { %888 = vmax.xlane.f32.xlu0 %v887_v54 }
 0x3d7   : > { %922 = vrot.lane.b32.xlu1 %v2110_v23, %s1942_s16 }
 0x3e0   : > { %v880_v55 = vpop.xlane.xlu1 %879 }
 0x3e1   : > { %v890_v56 = vsub.f32 %v874_v38, %v880_v55 }
 0x3e3   : > { %v894_v57 = vmul.f32 1.442695, %v890_v56 }
 0x3e5   : > { %1854 = vpow2.f32 %v894_v57 }
 0x3f2   : > { %v1855_v58 = vpop.eup %1854 }
 0x3f3   : > { %v902_v59 = vsel %vm560_vm2, %v1855_v58, 0.0 }
 0x3fb   : > { %903 = vadd.xlane.f32.xlu1 %v902_v59  ;;  %v1358_v59 = vld [vmem:[%s2351_s9 + $0x8] sm:$0xff] }
 0x44b   : > { %v883_v60 = vpop.xlane.xlu0 %882 }
 0x44c   : > { %v891_v61 = vsub.f32 %v875_v43, %v883_v60  ;;  %v1357_v60 = vld [vmem:[%s2351_s9] sm:$0xff] }
 0x44e   : > { %v896_v62 = vmul.f32 1.442695, %v891_v61  ;;  %v1461_v61 = vld [vmem:[%s2353_s11 + $0x78] sm:$0xff] }
 0x44f   : > { %v886_v63 = vpop.xlane.xlu1 %885 }
 0x450   : > { %1856 = vpow2.f32 %v896_v62  ;;  %v892_v1 = vsub.f32 %v876_v48, %v886_v63  ;;  %v1460_v62 = vld [vmem:[%s2353_s11 + $0x70] sm:$0xff]  ;;  %v1459_v63 = vld [vmem:[%s2353_s11 + $0x68] sm:$0xff] }
 0x452   : > { %v898_v2 = vmul.f32 1.442695, %v892_v1  ;;  %v1458_v1 = vld [vmem:[%s2353_s11 + $0x60] sm:$0xff] }
 0x453   : > { %v923_v3 = vpop.permute.xlu1 %922  ;;  %v889_v4 = vpop.xlane.xlu0 %888 }
 0x454   : > { %1858 = vpow2.f32 %v898_v2  ;;  %v893_v5 = vsub.f32 %v877_v53, %v889_v4  ;;  %1727 = vmatpush3.msra.mxu0 %v923_v3 }
 0x455   : > { %1736 = vmatprep.subr.mxu0 %v1936_v8 }
 0x456   : > { %v900_v6 = vmul.f32 1.442695, %v893_v5 }
 0x458   : > { %1860 = vpow2.f32 %v900_v6  ;;  %v1638_v6 = vld [vmem:[%s2349_s7] ss:$0 sm:$0xff] }
 0x45d   : > { %v1857_v7 = vpop.eup %1856 }
 0x45e   : > { %v905_v9 = vsel %vm560_vm2, %v1857_v7, 0.0 }
 0x45f   : > { %906 = vadd.xlane.f32.xlu0 %v905_v9  ;;  %v1639_v9 = vld [vmem:[%s2350_s8] ss:$0 sm:$0xff] }
 0x461   : > { %v1859_v10 = vpop.eup %1858 }
 0x462   : > { %v908_v11 = vsel %vm560_vm2, %v1859_v10, 0.0 }
 0x463   : > { %909 = vadd.xlane.f32.xlu1 %v908_v11 }
 0x465   : > { %v1861_v12 = vpop.eup %1860 }
 0x466   : > { %v911_v13 = vsel %vm560_vm2, %v1861_v12, 0.0 }
 0x467   : > { %912 = vadd.xlane.f32.xlu0 %v911_v13  ;;  %v1456_v13 = vld [vmem:[%s2353_s11 + $0x50] sm:$0xff] }
 0x474   : > { %1074 = vrot.lane.b32.xlu1 %v2119_v26, %s1942_s16 }
 0x478   : > { %1150 = vrot.lane.b32.xlu1 %v2122_v27, %s1942_s16 }
 0x47d   : > { %998 = vrot.lane.b32.xlu0 %v2116_v25, %s1942_s16  ;;  %s1644_s16 = sshll.u32 %s2038_s29, 7  ;;  %s1946_s29 = smov [#allocation2]  }
 0x47e   : > { %s1553_s1 = scalar_lea.hbm %s2355_s13, %s1644_s16 }
 0x484   : > { %v904_v14 = vpop.xlane.xlu1 %903 }
 0x485   : > { %1862 = vrcp.f32 %v904_v14  ;;  %v1455_v14 = vld [vmem:[%s2353_s11 + $0x48] sm:$0xff] }
 0x492   : > { %v1863_v15 = vpop.eup %1862 }
 0x493   : > { %v918_v16 = vmul.f32 %v1863_v15, %v1855_v58  ;;  %v1360_v58 = vld [vmem:[%s2351_s9 + $0x18] sm:$0xff]  ;;  %v1454_v15 = vld [vmem:[%s2353_s11 + $0x40] sm:$0xff] }
 0x495   : > { %1729 = vmatmul.mubr.msk.f32.vlgmr.msra.gmra.mxu0 %vm560_vm2, %v918_v16  ;;  %v1453_v16 = vld [vmem:[%s2353_s11 + $0x38] sm:$0xff] }
 0x496   : > { %1738 = vmatprep.mubr.msk.f32.mxu0 %vm1937_vm1, %v1936_v8 }
 0x4e8   : > { %v907_v17 = vpop.xlane.xlu0 %906 }
 0x4e9   : > { %1864 = vrcp.f32 %v907_v17  ;;  %v1452_v17 = vld [vmem:[%s2353_s11 + $0x30] sm:$0xff] }
 0x4ec   : > { %v910_v18 = vpop.xlane.xlu1 %909 }
 0x4ed   : > { %1866 = vrcp.f32 %v910_v18  ;;  %v1451_v18 = vld [vmem:[%s2353_s11 + $0x28] sm:$0xff] }
 0x4f0   : > { %v1075_v19 = vpop.permute.xlu1 %1074  ;;  %v913_v20 = vpop.xlane.xlu0 %912 }
 0x4f1   : > { %1868 = vrcp.f32 %v913_v20  ;;  %1737 = vmatpush3.msra.mxu0 %v1075_v19  ;;  %v1450_v19 = vld [vmem:[%s2353_s11 + $0x20] sm:$0xff]  ;;  %v1449_v20 = vld [vmem:[%s2353_s11 + $0x18] sm:$0xff] }
 0x4f2   : > { %1768 = vmatprep.subr.mxu0 %v1936_v8 }
 0x4f4   : > { %v999_v21 = vpop.permute.xlu0 %998  ;;  %v1151_v24 = vpop.permute.xlu1 %1150 }
 0x4f5   : > { %1732 = vmatpush3.msra.mxu1 %v999_v21  ;;  %v1448_v21 = vld [vmem:[%s2353_s11 + $0x10] sm:$0xff] }
 0x4f6   : > { %v1865_v22 = vpop.eup %1864  ;;  %1741 = vmatprep.subr.mxu1 %v1936_v8 }
 0x4f7   : > { %v919_v23 = vmul.f32 %v1865_v22, %v1857_v7  ;;  %v1447_v22 = vld [vmem:[%s2353_s11 + $0x8] sm:$0xff] }
 0x4f9   : > { %1734 = vmatmul.mubr.msk.f32.vlgmr.msra.gmra.mxu1 %vm560_vm2, %v919_v23  ;;  %v1446_v23 = vld [vmem:[%s2353_s11] sm:$0xff] }
 0x4fa   : > { %v1867_v25 = vpop.eup %1866  ;;  %1742 = vmatpush3.msra.mxu1 %v1151_v24  ;;  %1743 = vmatprep.mubr.msk.f32.mxu1 %vm1937_vm1, %v1936_v8  ;;  %v1640_v24 = vld [vmem:[%s2352_s10] ss:$0 sm:$0xff] }
 0x4fb   : > { %v920_v26 = vmul.f32 %v1867_v25, %v1859_v10  ;;  %1746 = vmatprep.subr.mxu1 %v1936_v8 }
 0x4fd   : > { %1739 = vmatmul.mubr.msk.f32.vlgmr.msra.gmra.mxu0 %vm560_vm2, %v920_v26 }
 0x4fe   : > { %v1869_v27 = vpop.eup %1868  ;;  %1800 = vmatprep.mubr.msk.f32.mxu0 %vm1937_vm1, %v1936_v8  ;;  %1769 = vmatpush3.msra.mxu0 %v1461_v61 }
 0x4ff   : > { %v921_v28 = vmul.f32 %v1869_v27, %v1861_v12  ;;  %1770 = vmatprep.subr.mxu0 %v1936_v8  ;;  %v1457_v12 = vld [vmem:[%s2353_s11 + $0x58] sm:$0xff] }
 0x500   : > { %1771 = vmatpush3.msra.mxu0 %v1460_v62 }
 0x501   : > { %1744 = vmatmul.mubr.msk.f32.vlgmr.msra.gmra.mxu1 %vm560_vm2, %v921_v28  ;;  %1772 = vmatprep.subr.mxu0 %v1936_v8 }
 0x502   : > { %1754 = vmatprep.mubr.msk.f32.mxu1 %vm1937_vm1, %v1936_v8  ;;  %1747 = vmatpush3.msra.mxu1 %v1246_v31 }
 0x503   : > { %1748 = vmatprep.subr.mxu1 %v1936_v8  ;;  %1773 = vmatpush3.msra.mxu0 %v1459_v63 }
 0x504   : > { %1749 = vmatpush3.msra.mxu1 %v1245_v32  ;;  %1774 = vmatprep.subr.mxu0 %v1936_v8 }
 0x505   : > { %1750 = vmatprep.subr.mxu1 %v1936_v8  ;;  %1775 = vmatpush3.msra.mxu0 %v1458_v1 }
 0x506   : > { %1751 = vmatpush3.msra.mxu1 %v1244_v33  ;;  %1776 = vmatprep.subr.mxu0 %v1936_v8 }
 0x507   : > { %1752 = vmatprep.subr.mxu1 %v1936_v8  ;;  %1777 = vmatpush3.msra.mxu0 %v1457_v12 }
 0x508   : > { %1753 = vmatpush3.msra.mxu1 %v1243_v34  ;;  %1778 = vmatprep.subr.mxu0 %v1936_v8 }
 0x509   : > { %1757 = vmatprep.subr.mxu1 %v1936_v8  ;;  %1779 = vmatpush3.msra.mxu0 %v1456_v13 }
 0x50a   : > { %1780 = vmatprep.subr.mxu0 %v1936_v8 }
 0x50b   : > { %1781 = vmatpush3.msra.mxu0 %v1455_v14 }
 0x50c   : > { %1782 = vmatprep.subr.mxu0 %v1936_v8 }
 0x50d   : > { %1783 = vmatpush3.msra.mxu0 %v1454_v15 }
 0x50e   : > { %1784 = vmatprep.subr.mxu0 %v1936_v8 }
 0x50f   : > { %1785 = vmatpush3.msra.mxu0 %v1453_v16 }
 0x510   : > { %1786 = vmatprep.subr.mxu0 %v1936_v8 }
 0x511   : > { %1787 = vmatpush3.msra.mxu0 %v1452_v17 }
 0x512   : > { %1788 = vmatprep.subr.mxu0 %v1936_v8 }
 0x513   : > { %1789 = vmatpush3.msra.mxu0 %v1451_v18 }
 0x514   : > { %1790 = vmatprep.subr.mxu0 %v1936_v8 }
 0x515   : > { %1791 = vmatpush3.msra.mxu0 %v1450_v19 }
 0x516   : > { %1792 = vmatprep.subr.mxu0 %v1936_v8 }
 0x517   : > { %1793 = vmatpush3.msra.mxu0 %v1449_v20 }
 0x518   : > { %1794 = vmatprep.subr.mxu0 %v1936_v8 }
 0x519   : > { %1795 = vmatpush3.msra.mxu0 %v1448_v21 }
 0x51a   : > { %1796 = vmatprep.subr.mxu0 %v1936_v8 }
 0x51b   : > { %1797 = vmatpush3.msra.mxu0 %v1447_v22 }
 0x51c   : > { %1798 = vmatprep.subr.mxu0 %v1936_v8 }
 0x51d   : > { %1799 = vmatpush3.msra.mxu0 %v1446_v23 }
 0x555   : > { %v994_v29 = vpop.f32.mrf.mxu0 }
 0x557   : > { %v1730_v30 = vpop.f32.mrf.mxu0 }
 0x5b9   : > { %v1070_v35 = vpop.f32.mrf.mxu1 }
 0x5ba   : > { %1227 = vrot.lane.b32.xlu0 %v1070_v35, %s1943_s20  ;;  %s431_s20 = scalar_lea.vmem [#allocation2], %s1618_s24  ;;  %s1878_s24 = sshll.u32 %s1946_s29, 4  ;;  %s1879_s24 = int_to_ptr.vmem [resolvable:$false] %s1878_s24 }
 0x5bb   : > { %v1735_v36 = vpop.f32.mrf.mxu1  ;;  %s1880_s30 = scalar_lea.vmem %s1879_s24, 256 }
 0x5bd   : > { %v1146_v37 = vpop.f32.mrf.mxu0 }
 0x5be   : > { %1231 = vrot.lane.b32.xlu1 %v1146_v37, %s1944_s21  ;;  %s1555_s21 = sshll.u32 %s431_s20, 4  ;;  %s1556_s21 = int_to_ptr.vmem [resolvable:$true] %s1555_s21 }
 0x5bf   : > { %v1740_v38 = vpop.f32.mrf.mxu0  ;;  %s1874_s3 = scalar_lea.vmem %s1556_s21, 128  ;;  %p1881_p0 = scmp.lt.s32.totalorder %s1556_s21, %s1879_s24 }
 0x5c0   : > { %p1875_p11 = scmp.ne.s32.totalorder %s1556_s21, %s1874_s3  ;;  %p1882_p1 = scmp.lt.s32.totalorder %s1880_s30, %s1874_s3 }
 0x5c1   : > { %v1222_v39 = vpop.f32.mrf.mxu1 }
 0x5c2   : > { %1235 = vrot.lane.b32.xlu0 %v1222_v39, %s1945_s22  ;;  %p1876_p12 = pnand %p1875_p11, %p2055_p5  ;;  %p1883_p2 = por %p1882_p1, %p1881_p0 }
 0x5c3   : > { %v1745_v40 = vpop.f32.mrf.mxu1 }
 0x5c4   : > { %p1877_p13 = pneg %p1876_p12 }
 0x5c6   : > { %p1884_p3 = pnand %p1883_p2, %p1877_p13 }
 0x62c   : > { %v1228_v41 = vpop.permute.xlu0 %1227 }
 0x62d   : > { %v1238_v43 = vsel %vm560_vm2, %v994_v29, %v1228_v41 }
 0x630   : > { %v1232_v42 = vpop.permute.xlu1 %1231 }
 0x631   : > { %v1240_v44 = vsel %vm1239_vm4, %v1238_v43, %v1232_v42 }
 0x634   : > { %v1236_v45 = vpop.permute.xlu0 %1235 }
 0x635   : > { %v1242_v46 = vsel %vm1241_vm5, %v1240_v44, %v1236_v45 }
 0x636   : > { %1755 = vmatmul.mubr.msk.f32.vlgmr.msra.gmra.mxu1 %vm437_vm0, %v1242_v46 }
 0x637   : > { %1765 = vmatprep.mubr.msk.f32.mxu1 %vm1937_vm1, %v1936_v8  ;;  %1758 = vmatpush3.msra.mxu1 %v1360_v58 }
 0x638   : > { %1759 = vmatprep.subr.mxu1 %v1936_v8 }
 0x6f6   : > { %v1323_v48 = vpop.f32.mrf.mxu1 }
 0x6f7   : > { %v1324_v49 = vadd.f32 %v1636_v47, %v1323_v48 }
 0x6f8   : > { %v1756_v50 = vpop.f32.mrf.mxu1 }
 0x6f9   : > { %v2209_v51 = vadd.f32 %v1324_v49, %v2070_v0  ;;  %v1359_v0 = vld [vmem:[%s2351_s9 + $0x10] sm:$0xff] }
 0x6fa   : > { %1760 = vmatpush3.msra.mxu1 %v1359_v0 }
 0x6fb   : > { %v1328_v52 = vsel %vm437_vm0, %v2209_v51, 0.0  ;;  %1761 = vmatprep.subr.mxu1 %v1936_v8 }
 0x6fc   : > { %1329 = vadd.xlane.f32.xlu1 %v1328_v52  ;;  %1762 = vmatpush3.msra.mxu1 %v1358_v59 }
 0x6fd   : > { %1763 = vmatprep.subr.mxu1 %v1936_v8  ;;  %v1642_v8 = vld [vmem:[%s2354_s12] ss:$0 sm:$0xff] }
 0x6fe   : > { %1764 = vmatpush3.msra.mxu1 %v1357_v60 }
 0x785   : > { %v1330_v53 = vpop.xlane.xlu1 %1329 }
 0x786   : > { %v1331_v54 = vmul.f32 0.03125, %v1330_v53 }
 0x788   : > { %v1332_v55 = vsub.f32 %v2209_v51, %v1331_v54 }
 0x78a   : > { %v1333_v56 = vmul.f32 %v1332_v55, %v1332_v55 }
 0x78c   : > { %v1334_v57 = vsel %vm437_vm0, %v1333_v56, 0.0 }
 0x78d   : > { %1335 = vadd.xlane.f32.xlu0 %v1334_v57 }
 0x816   : > { %v1336_v2 = vpop.xlane.xlu0 %1335 }
 0x817   : > { %v1337_v3 = vmul.f32 0.03125, %v1336_v2 }
 0x819   : > { %v1338_v4 = vadd.f32 1e-05, %v1337_v3 }
 0x81b   : > { %1870 = vrsqrt.f32 %v1338_v4 }
 0x828   : > { %v1871_v5 = vpop.eup %1870 }
 0x829   : > { %v1340_v7 = vmul.f32 %v1871_v5, %v1332_v55 }
 0x82b   : > { %v1348_v10 = vmul.f32 %v1638_v6, %v1340_v7 }
 0x82d   : > { %v1356_v11 = vadd.f32 %v1639_v9, %v1348_v10 }
 0x82f   : > { %1766 = vmatmul.mubr.msk.f32.vlgmr.msra.gmra.mxu1 %vm437_vm0, %v1356_v11 }
 0x8ef   : > { %v1437_v25 = vpop.f32.mrf.mxu1 }
 0x8f0   : > { %v1438_v26 = vadd.f32 %v1640_v24, %v1437_v25 }
 0x8f1   : > { %v1767_v27 = vpop.f32.mrf.mxu1 }
 0x8f2   : > { %v1442_v28 = vmul.f32 0.70710677, %v1438_v26  ;;  %v1441_v30 = vmul.f32 0.5, %v1438_v26 }
 0x8f4   : > { %1872 = verf.f32 %v1442_v28 }
 0x901   : > { %v1873_v29 = vpop.eup %1872 }
 0x902   : > { %v1444_v31 = vadd.f32 1.0, %v1873_v29 }
 0x904   : > { %v1445_v32 = vmul.f32 %v1444_v31, %v1441_v30 }
 0x906   : > { %1801 = vmatmul.mubr.f32.vlgmr.msra.gmra.mxu0 %v1445_v32 }
 0x9c6   : > { %v1535_v33 = vpop.f32.mrf.mxu0 }
 0x9c7   : > { %v1536_v34 = vadd.f32 %v1642_v8, %v1535_v33 }
 0x9c8   : > { %v1802_v35 = vpop.f32.mrf.mxu0 }
 0x9c9   : > { %v1539_v36 = vadd.f32 %v1536_v34, %v2209_v51 }
 0x9cb   : > { %1540 = vst.msk [vmem:[%s431_s20] sm:$0xff] %vm437_vm0, %v1539_v36 }
 0x9cc   : > { %1887 = shalt.err (!%p1884_p3)
}
 0x9cd   : > { %s1888_s0 = scalar_lea.hbm %s1553_s1, 128  ;;  %s1892_s16 = scalar_lea.hbm %s2355_s13, 256 }
 0x9ce   : > { %p1889_p4 = scmp.ne.s32.totalorder %s1553_s1, %s1888_s0  ;;  %p1893_p9 = scmp.lt.s32.totalorder %s1553_s1, %s2355_s13 }
 0x9cf   : > { %p1894_p10 = scmp.lt.s32.totalorder %s1892_s16, %s1888_s0 }
 0x9d0   : > { %p1890_p7 = pnand %p1889_p4, %p2055_p5 }
 0x9d1   : > { %p1895_p11 = por %p1894_p10, %p1893_p9 }
 0x9d2   : > { %p1891_p8 = pneg %p1890_p7 }
 0x9d4   : > { %p1896_p12 = pnand %p1895_p11, %p1891_p8 }
 0x9d6   : > { %1899 = shalt.err (!%p1896_p12)
}
 0x9d7   : > { %1803 = dma.vmem_to_hbm [thread:$0]  (%p2055_p5), %s1556_s21, 128, %s1553_s1, %s1542_s2  }
 0x9d8 PF: > { %p1809_p13 = scmp.ge.s32.totalorder %s1934_s28, 2  ;;  %s1567_s3 = sand.u32 1, %s1922_s25  }
 0x9d9   : > { %s1568_s29 = scalar_lea.sflag [#allocation3], %s1567_s3 }
 0x9da   : > { %p1806_p0 = pnand %p1809_p13, %p2059_p6 }
 0x9dc   : > { %p1807_p1 = pneg %p1806_p0 }
 0x9de   : > { %1917 = dma.done.wait (%p1807_p1), %s1568_s29, 128  }
 0x9df   : > { %1919 = vsyncadd (%p1807_p1), %s1568_s29, 4294967168  ;;  %p23_p2 = scmp.ge.s32.totalorder %s2042_s14, 4   ;;  %s2366_s25 = smov %s1926_s26 }
 0x9e0   : > { %s2367_s26 = smov %s1930_s27  ;;  %s2368_s27 = smov %s2053_s17 }
 0x9e1   : > { %s2369_s28 = smov %s2042_s14  ;;  %25 = sbr.rel (!%p23_p2) target bundleno = 8 (0x8), region = 107 }
 0x9e6   :  { %1573 = vsyncpa [#allocation3], 1 }
 0x9e7   :  { %1575 = vsyncpa [#allocation3 + $0x1], 1 }

</bundles_post_ra>
